<compile_context>
chip_gen: v5e
topology: v5e:2x2
jax: 0.10.0
libtpu: 0.0.40
codegen_flags: <defaults>
</compile_context>

<pallas_src>
import jax
import jax.numpy as jnp
from jax.experimental import pallas as pl
from jax.experimental.pallas import tpu as pltpu

BATCH = 16
IN_FEATURES = 128
D_DIM = 64
N_CLASS = 2
R = 16
LORA_ALPHA = 1.0
SCALING = LORA_ALPHA / R  # loralib default scaling = lora_alpha / r

TILE_B = 128  # rows per grid step (>= 128 to fill MXU rows / amortize step cost)


def _mlp_kernel(x_ref, w1t_ref, slab_ref, o_ref):
    # ---- layer1 (LoRA + scaling merged into w1t, bf16 MXU operands) ----
    x_bf = x_ref[...].astype(jnp.bfloat16)                               # (TB, IN)
    h = jnp.dot(x_bf, w1t_ref[...], preferred_element_type=jnp.float32)  # (TB, D) f32

    # ---- bias + ReLU (f32, VPU) ----
    b1 = slab_ref[0:1, :]                                                # (1, D)
    h = jnp.maximum(h + b1, 0.0)

    # ---- layer2 collapsed to the 2-class logit difference ----
    #   d = h @ (w2_eff[:,1] - w2_eff[:,0]) + (b2[1] - b2[0])
    w_diff = slab_ref[1:2, :]                                            # (1, D)
    b_diff = slab_ref[2:3, 0:1]                                          # (1, 1)
    d = jnp.sum(h * w_diff, axis=1, keepdims=True) + b_diff              # (TB, 1)

    # ---- 2-class LogSoftmax via softplus (elementwise VPU/EUP only) ----
    #   logp0 = -softplus(d), logp1 = d - softplus(d)
    sp = jnp.maximum(d, 0.0) + jnp.log(1.0 + jnp.exp(-jnp.abs(d)))       # softplus(d)
    o_ref[...] = jnp.concatenate([-sp, d - sp], axis=1)                  # (TB, 2)


def prepare_params(w1, b1, a1, lb1, w2, b2, a2, lb2):
    """One-time weight preparation (NOT in the per-call hot path).

    PyTorch/loralib storage layouts:
      w1: (D, IN)  b1: (D,)  a1: (R, IN)  lb1: (D, R)
      w2: (C, D)   b2: (C,)  a2: (R, D)   lb2: (C, R)
    Returns:
      w1_eff_t : (IN, D) bf16 -- LoRA-merged, scaling-folded, pre-transposed MXU operand
      slab     : (3, D)  f32  -- row0 = b1, row1 = w2 logit-difference column, row2[0] = b2 diff
    """
    w1_eff_t = (w1.T + SCALING * (a1.T @ lb1.T)).astype(jnp.bfloat16)    # (IN, D)
    w2_eff_t = w2.T + SCALING * (a2.T @ lb2.T)                           # (D, C)
    w_diff = w2_eff_t[:, 1] - w2_eff_t[:, 0]                             # (D,)
    b_diff = b2[1] - b2[0]
    slab = jnp.zeros((3, D_DIM), jnp.float32)
    slab = slab.at[0, :].set(b1)
    slab = slab.at[1, :].set(w_diff)
    slab = slab.at[2, 0].set(b_diff)
    return w1_eff_t, slab


@jax.jit
def lora_mlp_fused(x, w1_eff_t, slab):
    """x: (B, IN) f32; weights prepared by `prepare_params`. Returns (B, 2) log-probs."""
    B = x.shape[0]
    n_tiles = pl.cdiv(B, TILE_B)
    b_pad = n_tiles * TILE_B
    if b_pad != B:
        x = jnp.pad(x, ((0, b_pad - B), (0, 0)))

    out = pl.pallas_call(
        _mlp_kernel,
        out_shape=jax.ShapeDtypeStruct((b_pad, N_CLASS), jnp.float32),
        grid=(n_tiles,),
        in_specs=[
            pl.BlockSpec((TILE_B, IN_FEATURES), lambda i: (i, 0)),   # x tiles over batch
            pl.BlockSpec((IN_FEATURES, D_DIM), lambda i: (0, 0)),    # weight: resident
            pl.BlockSpec((3, D_DIM), lambda i: (0, 0)),              # small slab: resident
        ],
        out_specs=pl.BlockSpec((TILE_B, N_CLASS), lambda i: (i, 0)),
        compiler_params=pltpu.CompilerParams(
            dimension_semantics=("parallel",)),                      # megacore on v7x
    )(x, w1_eff_t, slab)

    return out[:B] if b_pad != B else out


def _reference(x, w1, b1, a1, lb1, w2, b2, a2, lb2):
    # Unmerged loralib forward (f32): y = x @ W^T + b + ((x @ A^T) @ B^T) * scaling
    h = x @ w1.T + b1 + (x @ a1.T @ lb1.T) * SCALING
    h = jnp.maximum(h, 0.0)
    z = h @ w2.T + b2 + (h @ a2.T @ lb2.T) * SCALING
    return jax.nn.log_softmax(z, axis=1)


if __name__ == "__main__":
    key = jax.random.PRNGKey(0)
    keys = jax.random.split(key, 10)

    # Deterministic synthetic parameters (shapes follow lora.Linear's __init__).
    x = jax.random.normal(keys[0], (BATCH, IN_FEATURES), dtype=jnp.float32)
    w1 = jax.random.normal(keys[1], (D_DIM, IN_FEATURES), dtype=jnp.float32) * 0.05
    b1 = jax.random.normal(keys[2], (D_DIM,), dtype=jnp.float32) * 0.05
    a1 = jax.random.normal(keys[3], (R, IN_FEATURES), dtype=jnp.float32) * 0.05
    lb1 = jax.random.normal(keys[4], (D_DIM, R), dtype=jnp.float32) * 0.05
    w2 = jax.random.normal(keys[5], (N_CLASS, D_DIM), dtype=jnp.float32) * 0.05
    b2 = jax.random.normal(keys[6], (N_CLASS,), dtype=jnp.float32) * 0.05
    a2 = jax.random.normal(keys[7], (R, D_DIM), dtype=jnp.float32) * 0.05
    lb2 = jax.random.normal(keys[8], (N_CLASS, R), dtype=jnp.float32) * 0.05

    # One-time prep (transpose + LoRA merge + bf16 cast + operand packing).
    params = jax.block_until_ready(prepare_params(w1, b1, a1, lb1, w2, b2, a2, lb2))
    w1_eff_t, slab = params

    # ---- spec-shaped batch (16 rows; padded to one 128-row grid step) ----
    out = jax.block_until_ready(lora_mlp_fused(x, w1_eff_t, slab))
    ref = _reference(x, w1, b1, a1, lb1, w2, b2, a2, lb2)
    assert out.shape == (BATCH, N_CLASS), out.shape
    # bf16 MXU operands -> looser tolerance than the pure-f32 version.
    assert jnp.allclose(out, ref, atol=2e-2, rtol=2e-2), (
        "mismatch vs reference (small batch): "
        f"max abs diff = {jnp.max(jnp.abs(out - ref))}")

    # ---- larger batch exercising multiple grid steps (amortized path) ----
    x_big = jax.random.normal(keys[9], (512, IN_FEATURES), dtype=jnp.float32)
    out_big = jax.block_until_ready(lora_mlp_fused(x_big, w1_eff_t, slab))
    ref_big = _reference(x_big, w1, b1, a1, lb1, w2, b2, a2, lb2)
    assert out_big.shape == (512, N_CLASS), out_big.shape
    assert jnp.allclose(out_big, ref_big, atol=2e-2, rtol=2e-2), (
        "mismatch vs reference (large batch): "
        f"max abs diff = {jnp.max(jnp.abs(out_big - ref_big))}")

    print("KERNEL_OK")
</pallas_src>

<mosaic_0001>
module attributes {stable_mosaic.version = 11 : i64} {
  func.func @_mlp_kernel(%arg0: i32, %arg1: memref<128x128xf32, #tpu.memory_space<vmem>>, %arg2: memref<128x64xbf16, #tpu.memory_space<vmem>>, %arg3: memref<3x64xf32, #tpu.memory_space<vmem>>, %arg4: memref<128x2xf32, #tpu.memory_space<vmem>>) attributes {dimension_semantics = [#tpu.dimension_semantics<parallel>], iteration_bounds = array<i64: 1>, scalar_prefetch = 0 : i64, scratch_operands = 0 : i64, tpu.core_type = #tpu.core_type<tc>, window_params = [{transform_indices = @transform_0, window_bounds = array<i64: 128, 128>}, {pipeline_mode = #tpu.pipeline_mode<synchronous>, transform_indices = @transform_1, window_bounds = array<i64: 128, 64>}, {pipeline_mode = #tpu.pipeline_mode<synchronous>, transform_indices = @transform_2, window_bounds = array<i64: 3, 64>}, {transform_indices = @transform_3, window_bounds = array<i64: 128, 2>}]} {
    %c0 = arith.constant 0 : index
    %c0_0 = arith.constant 0 : index
    %0 = vector.load %arg1[%c0, %c0_0] : memref<128x128xf32, #tpu.memory_space<vmem>>, vector<128x128xf32>
    %1 = arith.truncf %0 : vector<128x128xf32> to vector<128x128xbf16>
    %c0_1 = arith.constant 0 : index
    %c0_2 = arith.constant 0 : index
    %2 = vector.load %arg2[%c0_1, %c0_2] : memref<128x64xbf16, #tpu.memory_space<vmem>>, vector<128x64xbf16>
    %cst = arith.constant dense<0.000000e+00> : vector<128x64xf32>
    %3 = tpu.matmul %1, %2, %cst {dimension_numbers = #tpu.dot_dimension_numbers<[1], [0], [0], [1], [0, 0, 1, 1], [], []>} : vector<128x128xbf16>, vector<128x64xbf16>, vector<128x64xf32> -> vector<128x64xf32>
    %c0_3 = arith.constant 0 : index
    %c0_4 = arith.constant 0 : index
    %4 = vector.load %arg3[%c0_3, %c0_4] : memref<3x64xf32, #tpu.memory_space<vmem>>, vector<1x64xf32>
    %5 = vector.broadcast %4 : vector<1x64xf32> to vector<128x64xf32>
    %6 = arith.addf %3, %5 : vector<128x64xf32>
    %cst_5 = arith.constant 0.000000e+00 : f32
    %7 = vector.broadcast %cst_5 : f32 to vector<128x64xf32>
    %8 = arith.maximumf %6, %7 : vector<128x64xf32>
    %c1 = arith.constant 1 : index
    %c0_6 = arith.constant 0 : index
    %9 = vector.load %arg3[%c1, %c0_6] : memref<3x64xf32, #tpu.memory_space<vmem>>, vector<1x64xf32>
    %c2 = arith.constant 2 : index
    %c0_7 = arith.constant 0 : index
    %10 = vector.load %arg3[%c2, %c0_7] : memref<3x64xf32, #tpu.memory_space<vmem>>, vector<1x1xf32>
    %11 = vector.broadcast %9 : vector<1x64xf32> to vector<128x64xf32>
    %12 = arith.mulf %8, %11 : vector<128x64xf32>
    %cst_8 = arith.constant dense<0.000000e+00> : vector<128xf32>
    %13 = vector.multi_reduction <add>, %12, %cst_8 [1] : vector<128x64xf32> to vector<128xf32>
    %14 = vector.shape_cast %13 : vector<128xf32> to vector<128x1xf32>
    %15 = vector.broadcast %10 : vector<1x1xf32> to vector<128x1xf32>
    %16 = arith.addf %14, %15 : vector<128x1xf32>
    %cst_9 = arith.constant 0.000000e+00 : f32
    %17 = vector.broadcast %cst_9 : f32 to vector<128x1xf32>
    %18 = arith.maximumf %16, %17 : vector<128x1xf32>
    %19 = math.absf %16 : vector<128x1xf32>
    %cst_10 = arith.constant 0.000000e+00 : f32
    %20 = vector.broadcast %cst_10 : f32 to vector<128x1xf32>
    %21 = arith.subf %20, %19 : vector<128x1xf32>
    %22 = math.exp %21 : vector<128x1xf32>
    %cst_11 = arith.constant 1.000000e+00 : f32
    %23 = vector.broadcast %cst_11 : f32 to vector<128x1xf32>
    %24 = arith.addf %23, %22 : vector<128x1xf32>
    %25 = math.log %24 : vector<128x1xf32>
    %26 = arith.addf %18, %25 : vector<128x1xf32>
    %cst_12 = arith.constant 0.000000e+00 : f32
    %27 = vector.broadcast %cst_12 : f32 to vector<128x1xf32>
    %28 = arith.subf %27, %26 : vector<128x1xf32>
    %29 = arith.subf %16, %26 : vector<128x1xf32>
    %30 = tpu.concatenate %28, %29 in 1 : vector<128x1xf32>, vector<128x1xf32> -> vector<128x2xf32>
    %c0_13 = arith.constant 0 : index
    %c0_14 = arith.constant 0 : index
    %31 = vector.load %arg4[%c0_13, %c0_14] : memref<128x2xf32, #tpu.memory_space<vmem>>, vector<128x2xf32>
    tpu.vector_store %arg4[%c0_13, %c0_14], %30 {strides = array<i32>} : memref<128x2xf32, #tpu.memory_space<vmem>>, vector<128x2xf32>,
    return
  }
  func.func @transform_0(%arg0: i32) -> (i32, i32) {
    %c0_i32 = arith.constant 0 : i32
    %c0_i32_0 = arith.constant 0 : i32
    return %arg0, %c0_i32 : i32, i32
  }
  func.func @transform_1(%arg0: i32) -> (i32, i32) {
    %c0_i32 = arith.constant 0 : i32
    %c0_i32_0 = arith.constant 0 : i32
    %c0_i32_1 = arith.constant 0 : i32
    return %c0_i32, %c0_i32_0 : i32, i32
  }
  func.func @transform_2(%arg0: i32) -> (i32, i32) {
    %c0_i32 = arith.constant 0 : i32
    %c0_i32_0 = arith.constant 0 : i32
    %c0_i32_1 = arith.constant 0 : i32
    return %c0_i32, %c0_i32_0 : i32, i32
  }
  func.func @transform_3(%arg0: i32) -> (i32, i32) {
    %c0_i32 = arith.constant 0 : i32
    %c0_i32_0 = arith.constant 0 : i32
    return %arg0, %c0_i32 : i32, i32
  }
}

</mosaic_0001>

<bundles_post_ra>
// kernel: lora_mlp_fused.1
= control target key start
LH: loop header
LB: loop body
LE: loop exit
PB: predicated region body
PF: predicated region fallthrough
CT: control target
= control target key end

     0   :  { %vm188_vm0 = vcmask 523264   ;;  %vm494_vm1 = vcmask 7168   ;;  %vm511_vm2 = vcmask 15360   ;;  %s1071_s1 = inlined_call_operand.vmem [shape: bf16[128,64], index: 1, kind: input, shape index: {}]   ;;  %s1072_s2 = inlined_call_operand.vmem [shape: f32[3,64], index: 2, kind: input, shape index: {}]   ;;  %s1073_s0 = inlined_call_operand.vmem [shape: f32[128,128], index: 0, kind: input, shape index: {}]   ;;  %s1074_s3 = inlined_call_operand.vmem [shape: f32[128,2], index: 3, kind: output, shape index: {}]  }
   0x1   :  { %v571_v0 = vld [vmem:[%s1071_s1 + $0x38] sm:$0xff]  ;;  %v570_v1 = vld [vmem:[%s1071_s1 + $0x30] sm:$0xff]  ;;  %v569_v2 = vld [vmem:[%s1071_s1 + $0x28] sm:$0xff] }
   0x2   :  { %104 = vmatpush.bf16.msra.mxu0 %v571_v0  ;;  %572 = vmatpush.bf16.msra.mxu1 %v571_v0  ;;  %v568_v3 = vld [vmem:[%s1071_s1 + $0x20] sm:$0xff]  ;;  %v567_v4 = vld [vmem:[%s1071_s1 + $0x18] sm:$0xff]  ;;  %v566_v5 = vld [vmem:[%s1071_s1 + $0x10] sm:$0xff] }
   0x3   :  { %573 = vmatpush.bf16.msra.mxu2 %v571_v0  ;;  %574 = vmatpush.bf16.msra.mxu3 %v571_v0  ;;  %v565_v6 = vld [vmem:[%s1071_s1 + $0x8] sm:$0xff]  ;;  %v564_v7 = vld [vmem:[%s1071_s1] sm:$0xff]  ;;  %v16_v20 = vld [vmem:[%s1073_s0 + $0x10] sm:$0xff] }
   0x4   :  { %v14_v8 = vld [vmem:[%s1073_s0] sm:$0xff]  ;;  %v15_v9 = vld [vmem:[%s1073_s0 + $0x8] sm:$0xff]  ;;  %v17_v21 = vld [vmem:[%s1073_s0 + $0x18] sm:$0xff] }
   0x5   :  { %v18_v10 = vld [vmem:[%s1073_s0 + $0x20] sm:$0xff]  ;;  %v19_v11 = vld [vmem:[%s1073_s0 + $0x28] sm:$0xff]  ;;  %v30_v16 = vpack.c.bf16 %v15_v9, %v14_v8  ;;  %v24_v22 = vld [vmem:[%s1073_s0 + $0x50] sm:$0xff]  ;;  %v31_v28 = vpack.c.bf16 %v17_v21, %v16_v20 }
   0x6   :  { %105 = vmatpush.bf16.msra.mxu0 %v570_v1  ;;  %575 = vmatpush.bf16.msra.mxu1 %v570_v1  ;;  %v22_v12 = vld [vmem:[%s1073_s0 + $0x40] sm:$0xff]  ;;  %v23_v13 = vld [vmem:[%s1073_s0 + $0x48] sm:$0xff]  ;;  %v32_v17 = vpack.c.bf16 %v19_v11, %v18_v10  ;;  %v20_v23 = vld [vmem:[%s1073_s0 + $0x30] sm:$0xff] }
   0x7   :  { %576 = vmatpush.bf16.msra.mxu2 %v570_v1  ;;  %577 = vmatpush.bf16.msra.mxu3 %v570_v1  ;;  %v26_v14 = vld [vmem:[%s1073_s0 + $0x60] sm:$0xff]  ;;  %v27_v15 = vld [vmem:[%s1073_s0 + $0x68] sm:$0xff]  ;;  %v34_v18 = vpack.c.bf16 %v23_v13, %v22_v12  ;;  %v21_v24 = vld [vmem:[%s1073_s0 + $0x38] sm:$0xff] }
   0x8   :  { %v36_v19 = vpack.c.bf16 %v27_v15, %v26_v14  ;;  %v25_v25 = vld [vmem:[%s1073_s0 + $0x58] sm:$0xff]  ;;  %v28_v26 = vld [vmem:[%s1073_s0 + $0x70] sm:$0xff]  ;;  %v33_v29 = vpack.c.bf16 %v21_v24, %v20_v23  ;;  %v760_v32 = vld [vmem:[%s1072_s2] ss:$0 sm:$0xff] }
   0x9   :  { %v29_v27 = vld [vmem:[%s1073_s0 + $0x78] sm:$0xff]  ;;  %v35_v30 = vpack.c.bf16 %v25_v25, %v24_v22  ;;  %v767_v37 = vld [vmem:[%s1072_s2 + $0x1] ss:$0 sm:$0xff] }
   0xa   :  { %106 = vmatpush.bf16.msra.mxu0 %v569_v2  ;;  %578 = vmatpush.bf16.msra.mxu1 %v569_v2  ;;  %v37_v31 = vpack.c.bf16 %v29_v27, %v28_v26 }
   0xb   :  { %579 = vmatpush.bf16.msra.mxu2 %v569_v2  ;;  %580 = vmatpush.bf16.msra.mxu3 %v569_v2 }
   0xe   :  { %107 = vmatpush.bf16.msra.mxu0 %v568_v3  ;;  %581 = vmatpush.bf16.msra.mxu1 %v568_v3 }
   0xf   :  { %582 = vmatpush.bf16.msra.mxu2 %v568_v3  ;;  %583 = vmatpush.bf16.msra.mxu3 %v568_v3 }
  0x12   :  { %108 = vmatpush.bf16.msra.mxu0 %v567_v4  ;;  %584 = vmatpush.bf16.msra.mxu1 %v567_v4 }
  0x13   :  { %585 = vmatpush.bf16.msra.mxu2 %v567_v4  ;;  %586 = vmatpush.bf16.msra.mxu3 %v567_v4 }
  0x16   :  { %109 = vmatpush.bf16.msra.mxu0 %v566_v5  ;;  %587 = vmatpush.bf16.msra.mxu1 %v566_v5 }
  0x17   :  { %588 = vmatpush.bf16.msra.mxu2 %v566_v5  ;;  %589 = vmatpush.bf16.msra.mxu3 %v566_v5 }
  0x1a   :  { %110 = vmatpush.bf16.msra.mxu0 %v565_v6  ;;  %590 = vmatpush.bf16.msra.mxu1 %v565_v6 }
  0x1b   :  { %591 = vmatpush.bf16.msra.mxu2 %v565_v6  ;;  %592 = vmatpush.bf16.msra.mxu3 %v565_v6 }
  0x1e   :  { %111 = vmatpush.bf16.msra.mxu0 %v564_v7  ;;  %593 = vmatpush.bf16.msra.mxu1 %v564_v7 }
  0x1f   :  { %594 = vmatpush.bf16.msra.mxu2 %v564_v7  ;;  %595 = vmatpush.bf16.msra.mxu3 %v564_v7 }
  0x21   :  { %112 = vmatmul.bf16.vlgmr.msra.gmra.mxu0 %v30_v16  ;;  %122 = vmatmul.bf16.vlgmr.msra.gmra.mxu1 %v32_v17 }
  0x22   :  { %132 = vmatmul.bf16.vlgmr.msra.gmra.mxu2 %v34_v18  ;;  %142 = vmatmul.bf16.vlgmr.msra.gmra.mxu3 %v36_v19 }
  0x31   :  { %117 = vmatmul.bf16.gmra.mxu0 %v31_v28  ;;  %127 = vmatmul.bf16.gmra.mxu1 %v33_v29 }
  0x32   :  { %137 = vmatmul.bf16.gmra.mxu2 %v35_v30  ;;  %147 = vmatmul.bf16.gmra.mxu3 %v37_v31 }
  0x9e   :  { %v113_v33 = vpop.f32.mrf.mxu0  ;;  %v123_v34 = vpop.f32.mrf.mxu1 }
  0x9f   :  { %v114_v35 = vadd.f32 %v760_v32, %v113_v33  ;;  %v124_v36 = vadd.f32 %v760_v32, %v123_v34 }
  0xa1   :  { %v153_v38 = vmax.f32 %v114_v35, 0.0  ;;  %v157_v39 = vmax.f32 %v124_v36, 0.0 }
  0xa3   :  { %v176_v40 = vmul.f32 %v767_v37, %v157_v39  ;;  %v172_v41 = vmul.f32 %v767_v37, %v153_v38 }
  0xa5   :  { %v133_v42 = vpop.f32.mrf.mxu2  ;;  %v143_v43 = vpop.f32.mrf.mxu3  ;;  %v201_v44 = vsel %vm188_vm0, %v176_v40, 0.0  ;;  %v189_v45 = vsel %vm188_vm0, %v172_v41, 0.0 }
  0xa6   :  { %v134_v46 = vadd.f32 %v760_v32, %v133_v42  ;;  %v144_v47 = vadd.f32 %v760_v32, %v143_v43  ;;  %202 = vadd.xlane.f32.xlu2 %v201_v44  ;;  %v115_v48 = vpop.f32.mrf.mxu0  ;;  %190 = vadd.xlane.f32.xlu0 %v189_v45  ;;  %v125_v49 = vpop.f32.mrf.mxu1 }
  0xa7   :  { %v116_v52 = vadd.f32 %v760_v32, %v115_v48  ;;  %v126_v53 = vadd.f32 %v760_v32, %v125_v49 }
  0xa8   :  { %v161_v50 = vmax.f32 %v134_v46, 0.0  ;;  %v165_v51 = vmax.f32 %v144_v47, 0.0 }
  0xa9   :  { %v154_v57 = vmax.f32 %v116_v52, 0.0  ;;  %v158_v58 = vmax.f32 %v126_v53, 0.0 }
  0xaa   :  { %v180_v54 = vmul.f32 %v767_v37, %v161_v50  ;;  %v184_v55 = vmul.f32 %v767_v37, %v165_v51 }
  0xab   :  { %v177_v3 = vmul.f32 %v767_v37, %v158_v58  ;;  %v173_v4 = vmul.f32 %v767_v37, %v154_v57 }
  0xac   :  { %v213_v56 = vsel %vm188_vm0, %v180_v54, 0.0  ;;  %v225_v61 = vsel %vm188_vm0, %v184_v55, 0.0 }
  0xad   :  { %v135_v59 = vpop.f32.mrf.mxu2  ;;  %v145_v60 = vpop.f32.mrf.mxu3  ;;  %v204_v11 = vsel %vm188_vm0, %v177_v3, 0.0  ;;  %v192_v12 = vsel %vm188_vm0, %v173_v4, 0.0 }
  0xae   :  { %v146_v62 = vadd.f32 %v760_v32, %v145_v60  ;;  %214 = vadd.xlane.f32.xlu2 %v213_v56  ;;  %v118_v63 = vpop.f32.mrf.mxu0  ;;  %226 = vadd.xlane.f32.xlu0 %v225_v61  ;;  %v136_v2 = vadd.f32 %v760_v32, %v135_v59  ;;  %v128_v15 = vpop.f32.mrf.mxu1 }
  0xaf   :  { %v119_v0 = vadd.f32 %v760_v32, %v118_v63  ;;  %v129_v17 = vadd.f32 %v760_v32, %v128_v15 }
  0xb0   :  { %v166_v1 = vmax.f32 %v146_v62, 0.0  ;;  %v162_v8 = vmax.f32 %v136_v2, 0.0 }
  0xb1   :  { %v155_v5 = vmax.f32 %v119_v0, 0.0  ;;  %v159_v23 = vmax.f32 %v129_v17, 0.0 }
  0xb2   :  { %v185_v6 = vmul.f32 %v767_v37, %v166_v1  ;;  %v181_v19 = vmul.f32 %v767_v37, %v162_v8 }
  0xb3   :  { %v174_v16 = vmul.f32 %v767_v37, %v155_v5  ;;  %v178_v31 = vmul.f32 %v767_v37, %v159_v23 }
  0xb4   :  { %v228_v7 = vsel %vm188_vm0, %v185_v6, 0.0  ;;  %v216_v27 = vsel %vm188_vm0, %v181_v19, 0.0 }
  0xb5   :  { %229 = vadd.xlane.f32.xlu1 %v228_v7  ;;  %v138_v9 = vpop.f32.mrf.mxu2  ;;  %v148_v10 = vpop.f32.mrf.mxu3  ;;  %v195_v21 = vsel %vm188_vm0, %v174_v16, 0.0  ;;  %v207_v39 = vsel %vm188_vm0, %v178_v31, 0.0 }
  0xb6   :  { %v139_v13 = vadd.f32 %v760_v32, %v138_v9  ;;  %v149_v14 = vadd.f32 %v760_v32, %v148_v10  ;;  %205 = vadd.xlane.f32.xlu2 %v204_v11  ;;  %193 = vadd.xlane.f32.xlu0 %v192_v12  ;;  %v120_v25 = vpop.f32.mrf.mxu0  ;;  %v130_v41 = vpop.f32.mrf.mxu1 }
  0xb7   :  { %v121_v33 = vadd.f32 %v760_v32, %v120_v25  ;;  %v131_v44 = vadd.f32 %v760_v32, %v130_v41 }
  0xb8   :  { %v167_v18 = vmax.f32 %v149_v14, 0.0  ;;  %v163_v20 = vmax.f32 %v139_v13, 0.0 }
  0xb9   :  { %v156_v40 = vmax.f32 %v121_v33, 0.0  ;;  %v160_v47 = vmax.f32 %v131_v44, 0.0 }
  0xba   :  { %v186_v22 = vmul.f32 %v767_v37, %v167_v18  ;;  %v182_v30 = vmul.f32 %v767_v37, %v163_v20 }
  0xbb   :  { %v175_v45 = vmul.f32 %v767_v37, %v156_v40  ;;  %v179_v50 = vmul.f32 %v767_v37, %v160_v47 }
  0xbc   :  { %v231_v24 = vsel %vm188_vm0, %v186_v22, 0.0  ;;  %v219_v36 = vsel %vm188_vm0, %v182_v30, 0.0 }
  0xbd   :  { %v140_v26 = vpop.f32.mrf.mxu2  ;;  %196 = vadd.xlane.f32.xlu1 %v195_v21  ;;  %v150_v29 = vpop.f32.mrf.mxu3  ;;  %v198_v48 = vsel %vm188_vm0, %v175_v45, 0.0  ;;  %v210_v51 = vsel %vm188_vm0, %v179_v50, 0.0 }
  0xbe   :  { %v141_v28 = vadd.f32 %v760_v32, %v140_v26  ;;  %232 = vadd.xlane.f32.xlu2 %v231_v24  ;;  %217 = vadd.xlane.f32.xlu0 %v216_v27  ;;  %v151_v35 = vadd.f32 %v760_v32, %v150_v29  ;;  %v818_v32 = vld [vmem:[%s1072_s2 + $0x2] ss:$0 sm:$0xff]  ;;  %s664_s2 = smov 1  }
  0xc0   :  { %v164_v34 = vmax.f32 %v141_v28, 0.0  ;;  %v168_v42 = vmax.f32 %v151_v35, 0.0 }
  0xc2   :  { %v183_v38 = vmul.f32 %v767_v37, %v164_v34  ;;  %v187_v46 = vmul.f32 %v767_v37, %v168_v42 }
  0xc4   :  { %v222_v43 = vsel %vm188_vm0, %v183_v38, 0.0  ;;  %v234_v49 = vsel %vm188_vm0, %v187_v46, 0.0 }
  0xc5   :  { %220 = vadd.xlane.f32.xlu1 %v219_v36 }
  0xc6   :  { %223 = vadd.xlane.f32.xlu2 %v222_v43  ;;  %208 = vadd.xlane.f32.xlu0 %v207_v39 }
  0xcd   :  { %199 = vadd.xlane.f32.xlu1 %v198_v48 }
  0xce   :  { %235 = vadd.xlane.f32.xlu0 %v234_v49 }
  0xd5   :  { %211 = vadd.xlane.f32.xlu1 %v210_v51 }
 0x119   :  { %v203_v52 = vpop.xlane.xlu2 %202  ;;  %v191_v53 = vpop.xlane.xlu0 %190 }
 0x11a   :  { %v821_v54 = vadd.f32 %v818_v32, %v203_v52  ;;  %v824_v55 = vadd.f32 %v818_v32, %v191_v53 }
 0x11c   :  { %v274_v56 = vand.u32 2147483647, %v821_v54  ;;  %v270_v37 = vand.u32 2147483647, %v824_v55  ;;  %v254_v33 = vmax.f32 %v824_v55, 0.0  ;;  %v258_v48 = vmax.f32 %v821_v54, 0.0 }
 0x11e   :  { %v290_v57 = vsub.f32 0.0, %v274_v56  ;;  %v286_v58 = vsub.f32 0.0, %v270_v37 }
 0x120   :  { %v310_v59 = vmul.f32 1.442695, %v290_v57  ;;  %v302_v60 = vmul.f32 1.442695, %v286_v58 }
 0x121   :  { %v215_v61 = vpop.xlane.xlu2 %214  ;;  %v227_v62 = vpop.xlane.xlu0 %226 }
 0x122   :  { %600 = vpow2.f32 %v310_v59  ;;  %v829_v63 = vadd.f32 %v818_v32, %v215_v61  ;;  %v832_v0 = vadd.f32 %v818_v32, %v227_v62 }
 0x123   :  { %602 = vpow2.f32 %v302_v60 }
 0x124   :  { %v278_v1 = vand.u32 2147483647, %v829_v63  ;;  %v282_v2 = vand.u32 2147483647, %v832_v0  ;;  %v262_v52 = vmax.f32 %v829_v63, 0.0 }
 0x126   :  { %v294_v3 = vsub.f32 0.0, %v278_v1  ;;  %v298_v4 = vsub.f32 0.0, %v282_v2 }
 0x128   :  { %v601_v5 = vpop.eup %600  ;;  %v318_v6 = vmul.f32 1.442695, %v294_v3  ;;  %v836_v7 = vpop.xlane.xlu1 %229  ;;  %v326_v10 = vmul.f32 1.442695, %v298_v4  ;;  %v266_v4 = vmax.f32 %v832_v0, 0.0 }
 0x129   :  { %v603_v8 = vpop.eup %602  ;;  %v338_v9 = vadd.f32 1.0, %v601_v5  ;;  %v206_v11 = vpop.xlane.xlu2 %205 }
 0x12a   :  { %v194_v12 = vpop.xlane.xlu0 %193  ;;  %v334_v13 = vadd.f32 1.0, %v603_v8  ;;  %604 = vpow2.f32 %v318_v6  ;;  %v839_v14 = vadd.f32 %v818_v32, %v206_v11  ;;  %v885_v11 = vadd.f32 %v818_v32, %v836_v7 }
 0x12b   :  { %v842_v15 = vadd.f32 %v818_v32, %v194_v12 }
 0x12c   :  { %606 = vlog2.f32 %v334_v13  ;;  %v275_v16 = vand.u32 2147483647, %v839_v14 }
 0x12d   :  { %608 = vpow2.f32 %v326_v10  ;;  %v271_v17 = vand.u32 2147483647, %v842_v15 }
 0x12e   :  { %610 = vlog2.f32 %v338_v9  ;;  %v291_v18 = vsub.f32 0.0, %v275_v16 }
 0x12f   :  { %v287_v19 = vsub.f32 0.0, %v271_v17 }
 0x130   :  { %v605_v20 = vpop.eup %604  ;;  %v312_v21 = vmul.f32 1.442695, %v291_v18  ;;  %v197_v22 = vpop.xlane.xlu1 %196 }
 0x131   :  { %v342_v23 = vadd.f32 1.0, %v605_v20  ;;  %v304_v24 = vmul.f32 1.442695, %v287_v19  ;;  %v847_v25 = vadd.f32 %v818_v32, %v197_v22  ;;  %v233_v26 = vpop.xlane.xlu2 %232 }
 0x132   :  { %v218_v27 = vpop.xlane.xlu0 %217  ;;  %v607_v28 = vpop.eup %606  ;;  %612 = vpow2.f32 %v312_v21  ;;  %v850_v29 = vadd.f32 %v818_v32, %v233_v26  ;;  %v259_v26 = vmax.f32 %v839_v14, 0.0 }
 0x133   :  { %v853_v30 = vadd.f32 %v818_v32, %v218_v27  ;;  %v609_v31 = vpop.eup %608  ;;  %614 = vlog2.f32 %v342_v23  ;;  %v272_v34 = vand.u32 2147483647, %v847_v25  ;;  %v351_v35 = vmul.f32 0.6931472, %v607_v28 }
 0x134   :  { %v611_v36 = vpop.eup %610  ;;  %v346_v38 = vadd.f32 1.0, %v609_v31  ;;  %616 = vpow2.f32 %v304_v24  ;;  %v284_v39 = vand.u32 2147483647, %v850_v29 }
 0x135   :  { %v288_v40 = vsub.f32 0.0, %v272_v34  ;;  %v279_v41 = vand.u32 2147483647, %v853_v30  ;;  %v859_v42 = vadd.f32 %v351_v35, %v254_v33  ;;  %v359_v46 = vmul.f32 0.6931472, %v611_v36 }
 0x136   :  { %618 = vlog2.f32 %v346_v38  ;;  %v300_v49 = vsub.f32 0.0, %v284_v39  ;;  %v283_v35 = vand.u32 2147483647, %v885_v11 }
 0x137   :  { %v306_v43 = vmul.f32 1.442695, %v288_v40  ;;  %v295_v44 = vsub.f32 0.0, %v279_v41  ;;  %v414_v45 = vsub.f32 %v824_v55, %v859_v42  ;;  %v876_v2 = vadd.f32 %v359_v46, %v258_v48 }
 0x138   :  { %v613_v47 = vpop.eup %612  ;;  %v221_v50 = vpop.xlane.xlu1 %220  ;;  %v330_v5 = vmul.f32 1.442695, %v300_v49  ;;  %v299_v49 = vsub.f32 0.0, %v283_v35 }
 0x139   :  { %v615_v51 = vpop.eup %614  ;;  %v339_v53 = vadd.f32 1.0, %v613_v47  ;;  %620 = vpow2.f32 %v306_v43  ;;  %v866_v56 = vadd.f32 %v818_v32, %v221_v50  ;;  %446 = vrot.lane.b32.xlu1 %v414_v45, %s664_s2  ;;  %v224_v37 = vpop.xlane.xlu2 %223  ;;  %v320_v58 = vmul.f32 1.442695, %v295_v44 }
 0x13a   :  { %v209_v57 = vpop.xlane.xlu0 %208  ;;  %v617_v55 = vpop.eup %616  ;;  %v870_v59 = vadd.f32 %v818_v32, %v224_v37  ;;  %v367_v61 = vmul.f32 0.6931472, %v615_v51  ;;  %v418_v20 = vsub.f32 %v821_v54, %v876_v2 }
 0x13b   :  { %v873_v60 = vadd.f32 %v818_v32, %v209_v57  ;;  %622 = vlog2.f32 %v339_v53  ;;  %v335_v62 = vadd.f32 1.0, %v617_v55  ;;  %v280_v1 = vand.u32 2147483647, %v866_v56 }
 0x13c   :  { %v619_v3 = vpop.eup %618  ;;  %v281_v6 = vand.u32 2147483647, %v870_v59  ;;  %v881_v10 = vadd.f32 %v367_v61, %v262_v52 }
 0x13d   :  { %624 = vlog2.f32 %v335_v62  ;;  %v296_v8 = vsub.f32 0.0, %v280_v1  ;;  %v276_v9 = vand.u32 2147483647, %v873_v60  ;;  %v375_v13 = vmul.f32 0.6931472, %v619_v3 }
 0x13e   :  { %626 = vpow2.f32 %v320_v58  ;;  %v297_v12 = vsub.f32 0.0, %v281_v6  ;;  %v422_v19 = vsub.f32 %v829_v63, %v881_v10  ;;  %v256_v1 = vmax.f32 %v847_v25, 0.0 }
 0x13f   :  { %v621_v16 = vpop.eup %620  ;;  %v322_v17 = vmul.f32 1.442695, %v296_v8  ;;  %v292_v18 = vsub.f32 0.0, %v276_v9  ;;  %628 = vpow2.f32 %v330_v5  ;;  %v891_v24 = vadd.f32 %v375_v13, %v266_v4 }
 0x140   :  { %v336_v21 = vadd.f32 1.0, %v621_v16  ;;  %v324_v22 = vmul.f32 1.442695, %v297_v12  ;;  %v200_v23 = vpop.xlane.xlu1 %199  ;;  %462 = vrot.lane.b32.xlu0 %v422_v19, %s664_s2  ;;  %v328_v5 = vmul.f32 1.442695, %v299_v49  ;;  %v263_v12 = vmax.f32 %v853_v30, 0.0 }
 0x141   :  { %v623_v7 = vpop.eup %622  ;;  %630 = vpow2.f32 %v322_v17  ;;  %v314_v27 = vmul.f32 1.442695, %v292_v18  ;;  %v895_v28 = vadd.f32 %v818_v32, %v200_v23  ;;  %454 = vrot.lane.b32.xlu1 %v418_v20, %s664_s2  ;;  %v426_v54 = vsub.f32 %v832_v0, %v891_v24 }
 0x142   :  { %v236_v63 = vpop.xlane.xlu0 %235  ;;  %632 = vlog2.f32 %v336_v21  ;;  %v361_v33 = vmul.f32 0.6931472, %v623_v7  ;;  %v255_v0 = vmax.f32 %v842_v15, 0.0  ;;  %v264_v23 = vmax.f32 %v866_v56, 0.0 }
 0x143   :  { %v902_v31 = vadd.f32 %v818_v32, %v236_v63  ;;  %v625_v34 = vpop.eup %624  ;;  %634 = vpow2.f32 %v324_v22  ;;  %v273_v36 = vand.u32 2147483647, %v895_v28  ;;  %470 = vrot.lane.b32.xlu2 %v426_v54, %s664_s2  ;;  %v265_v54 = vmax.f32 %v870_v59, 0.0 }
 0x144   :  { %v627_v38 = vpop.eup %626  ;;  %636 = vpow2.f32 %v314_v27  ;;  %v908_v40 = vadd.f32 %v361_v33, %v259_v26  ;;  %v353_v44 = vmul.f32 0.6931472, %v625_v34  ;;  %v260_v35 = vmax.f32 %v873_v60, 0.0 }
 0x145   :  { %v285_v39 = vand.u32 2147483647, %v902_v31  ;;  %v343_v41 = vadd.f32 1.0, %v627_v38  ;;  %v289_v43 = vsub.f32 0.0, %v273_v36  ;;  %v629_v45 = vpop.eup %628 }
 0x146   :  { %v419_v47 = vsub.f32 %v839_v14, %v908_v40  ;;  %v913_v51 = vadd.f32 %v353_v44, %v255_v0  ;;  %v348_v3 = vadd.f32 1.0, %v629_v45 }
 0x147   :  { %v301_v46 = vsub.f32 0.0, %v285_v39  ;;  %v631_v48 = vpop.eup %630  ;;  %638 = vlog2.f32 %v343_v41  ;;  %v308_v50 = vmul.f32 1.442695, %v289_v43 }
 0x148   :  { %v633_v52 = vpop.eup %632  ;;  %v344_v53 = vadd.f32 1.0, %v631_v48  ;;  %v212_v57 = vpop.xlane.xlu1 %211  ;;  %456 = vrot.lane.b32.xlu0 %v419_v47, %s664_s2  ;;  %v415_v14 = vsub.f32 %v842_v15, %v913_v51 }
 0x149   :  { %v332_v37 = vmul.f32 1.442695, %v301_v46  ;;  %v635_v55 = vpop.eup %634  ;;  %640 = vpow2.f32 %v308_v50  ;;  %v916_v58 = vadd.f32 %v818_v32, %v212_v57  ;;  %v355_v61 = vmul.f32 0.6931472, %v633_v52 }
 0x14a   :  { %v637_v62 = vpop.eup %636  ;;  %642 = vlog2.f32 %v344_v53  ;;  %v345_v4 = vadd.f32 1.0, %v635_v55  ;;  %v268_v50 = vmax.f32 %v850_v29, 0.0  ;;  %v257_v53 = vmax.f32 %v895_v28, 0.0 }
 0x14b   :  { %v340_v6 = vadd.f32 1.0, %v637_v62  ;;  %644 = vpow2.f32 %v332_v37  ;;  %v277_v8 = vand.u32 2147483647, %v916_v58  ;;  %448 = vrot.lane.b32.xlu2 %v415_v14, %s664_s2  ;;  %v924_v32 = vadd.f32 %v355_v61, %v256_v1 }
 0x14c   :  { %646 = vlog2.f32 %v345_v4  ;;  %v261_v55 = vmax.f32 %v916_v58, 0.0  ;;  %v269_v4 = vmax.f32 %v902_v31, 0.0 }
 0x14d   :  { %v639_v9 = vpop.eup %638  ;;  %648 = vlog2.f32 %v340_v6  ;;  %v293_v15 = vsub.f32 0.0, %v277_v8  ;;  %v416_v18 = vsub.f32 %v847_v25, %v924_v32  ;;  %v267_v8 = vmax.f32 %v885_v11, 0.0 }
 0x14e   :  { %650 = vlog2.f32 %v348_v3  ;;  %v369_v13 = vmul.f32 0.6931472, %v639_v9 }
 0x14f   :  { %v641_v16 = vpop.eup %640  ;;  %652 = vpow2.f32 %v328_v5  ;;  %v316_v17 = vmul.f32 1.442695, %v293_v15 }
 0x150   :  { %v643_v19 = vpop.eup %642  ;;  %v337_v20 = vadd.f32 1.0, %v641_v16  ;;  %v929_v21 = vadd.f32 %v369_v13, %v263_v12  ;;  %450 = vrot.lane.b32.xlu0 %v416_v18, %s664_s2 }
 0x151   :  { %v645_v22 = vpop.eup %644  ;;  %654 = vpow2.f32 %v316_v17  ;;  %v371_v7 = vmul.f32 0.6931472, %v643_v19 }
 0x152   :  { %v647_v26 = vpop.eup %646  ;;  %656 = vlog2.f32 %v337_v20  ;;  %v423_v27 = vsub.f32 %v853_v30, %v929_v21  ;;  %v349_v39 = vadd.f32 1.0, %v645_v22  ;;  %v406_v22 = vsub.f32 0.0, %v881_v10 }
 0x153   :  { %v649_v63 = vpop.eup %648  ;;  %v936_v25 = vadd.f32 %v371_v7, %v264_v23  ;;  %v373_v33 = vmul.f32 0.6931472, %v647_v26  ;;  %v403_v10 = vsub.f32 0.0, %v908_v40 }
 0x154   :  { %v651_v34 = vpop.eup %650  ;;  %464 = vrot.lane.b32.xlu2 %v423_v27, %s664_s2  ;;  %v363_v36 = vmul.f32 0.6931472, %v649_v63  ;;  %658 = vlog2.f32 %v349_v39 }
 0x155   :  { %v653_v38 = vpop.eup %652  ;;  %v424_v0 = vsub.f32 %v866_v56, %v936_v25  ;;  %v942_v41 = vadd.f32 %v373_v33, %v265_v54  ;;  %v379_v45 = vmul.f32 0.6931472, %v651_v34 }
 0x156   :  { %v944_v30 = vadd.f32 %v363_v36, %v260_v35  ;;  %v347_v47 = vadd.f32 1.0, %v653_v38  ;;  %v400_v38 = vsub.f32 0.0, %v924_v32 }
 0x157   :  { %v655_v43 = vpop.eup %654  ;;  %466 = vrot.lane.b32.xlu1 %v424_v0, %s664_s2  ;;  %v425_v44 = vsub.f32 %v870_v59, %v942_v41  ;;  %v953_v52 = vadd.f32 %v379_v45, %v268_v50 }
 0x158   :  { %v657_v46 = vpop.eup %656  ;;  %v341_v48 = vadd.f32 1.0, %v655_v43  ;;  %v420_v49 = vsub.f32 %v873_v60, %v944_v30 }
 0x159   :  { %468 = vrot.lane.b32.xlu0 %v425_v44, %s664_s2  ;;  %v357_v56 = vmul.f32 0.6931472, %v657_v46  ;;  %v428_v57 = vsub.f32 %v850_v29, %v953_v52  ;;  %v408_v44 = vsub.f32 0.0, %v936_v25  ;;  %v409_v46 = vsub.f32 0.0, %v942_v41 }
 0x15a   :  { %660 = vlog2.f32 %v341_v48  ;;  %v659_v37 = vpop.eup %658  ;;  %v412_v25 = vsub.f32 0.0, %v953_v52 }
 0x15b   :  { %662 = vlog2.f32 %v347_v47  ;;  %v385_v59 = vadd.f32 %v357_v56, %v257_v53  ;;  %v381_v1 = vmul.f32 0.6931472, %v659_v37 }
 0x15c   :  { %458 = vrot.lane.b32.xlu2 %v420_v49, %s664_s2 }
 0x15d   :  { %v417_v62 = vsub.f32 %v895_v28, %v385_v59  ;;  %v397_v6 = vadd.f32 %v381_v1, %v269_v4  ;;  %v401_v34 = vsub.f32 0.0, %v385_v59 }
 0x15f   :  { %v429_v28 = vsub.f32 %v902_v31, %v397_v6  ;;  %v399_v31 = vsub.f32 0.0, %v913_v51  ;;  %v407_v51 = vsub.f32 0.0, %v929_v21  ;;  %v404_v21 = vsub.f32 0.0, %v944_v30 }
 0x160   :  { %v661_v60 = vpop.eup %660  ;;  %v413_v0 = vsub.f32 0.0, %v397_v6 }
 0x161   :  { %474 = vrot.lane.b32.xlu0 %v428_v57, %s664_s2  ;;  %v365_v14 = vmul.f32 0.6931472, %v661_v60  ;;  %v663_v61 = vpop.eup %662 }
 0x162   :  { %v377_v29 = vmul.f32 0.6931472, %v663_v61 }
 0x163   :  { %v962_v3 = vadd.f32 %v365_v14, %v261_v55 }
 0x164   :  { %452 = vrot.lane.b32.xlu2 %v417_v62, %s664_s2  ;;  %v970_v9 = vadd.f32 %v377_v29, %v267_v8 }
 0x165   :  { %v421_v5 = vsub.f32 %v916_v58, %v962_v3  ;;  %v410_v58 = vsub.f32 0.0, %v891_v24  ;;  %v405_v41 = vsub.f32 0.0, %v962_v3 }
 0x166   :  { %v427_v15 = vsub.f32 %v885_v11, %v970_v9  ;;  %v398_v11 = vsub.f32 0.0, %v859_v42  ;;  %v402_v42 = vsub.f32 0.0, %v876_v2  ;;  %v411_v52 = vsub.f32 0.0, %v970_v9 }
 0x167   :  { %460 = vrot.lane.b32.xlu1 %v421_v5, %s664_s2 }
 0x16c   :  { %476 = vrot.lane.b32.xlu2 %v429_v28, %s664_s2 }
 0x16f   :  { %472 = vrot.lane.b32.xlu1 %v427_v15, %s664_s2 }
 0x19d   :  { %v471_v12 = vpop.permute.xlu2 %470 }
 0x19e   :  { %v507_v13 = vsel %vm494_vm1, %v410_v58, %v471_v12 }
 0x19f   :  { %524 = vst.msk [vmem:[%s1074_s3 + $0x60] sm:$0xff] %vm511_vm2, %v507_v13 }
 0x1a5   :  { %v449_v16 = vpop.permute.xlu2 %448 }
 0x1a6   :  { %v496_v17 = vsel %vm494_vm1, %v399_v31, %v449_v16 }
 0x1a7   :  { %513 = vst.msk [vmem:[%s1074_s3 + $0x8] sm:$0xff] %vm511_vm2, %v496_v17 }
 0x1ab   :  { %v447_v24 = vpop.permute.xlu1 %446 }
 0x1ac   :  { %v495_v18 = vsel %vm494_vm1, %v398_v11, %v447_v24 }
 0x1ad   :  { %512 = vst.msk [vmem:[%s1074_s3] sm:$0xff] %vm511_vm2, %v495_v18 }
 0x1ae   :  { %v465_v19 = vpop.permute.xlu2 %464 }
 0x1af   :  { %v504_v20 = vsel %vm494_vm1, %v407_v51, %v465_v19 }
 0x1b0   :  { %521 = vst.msk [vmem:[%s1074_s3 + $0x48] sm:$0xff] %vm511_vm2, %v504_v20 }
 0x1b2   :  { %v463_v7 = vpop.permute.xlu0 %462 }
 0x1b3   :  { %v455_v23 = vpop.permute.xlu1 %454  ;;  %v503_v27 = vsel %vm494_vm1, %v406_v22, %v463_v7 }
 0x1b4   :  { %v499_v26 = vsel %vm494_vm1, %v402_v42, %v455_v23  ;;  %520 = vst.msk [vmem:[%s1074_s3 + $0x40] sm:$0xff] %vm511_vm2, %v503_v27 }
 0x1b5   :  { %516 = vst.msk [vmem:[%s1074_s3 + $0x20] sm:$0xff] %vm511_vm2, %v499_v26 }
 0x1b6   :  { %v459_v63 = vpop.permute.xlu2 %458 }
 0x1b7   :  { %v501_v2 = vsel %vm494_vm1, %v404_v21, %v459_v63 }
 0x1b8   :  { %518 = vst.msk [vmem:[%s1074_s3 + $0x30] sm:$0xff] %vm511_vm2, %v501_v2 }
 0x1ba   :  { %v457_v54 = vpop.permute.xlu0 %456 }
 0x1bb   :  { %v500_v33 = vsel %vm494_vm1, %v403_v10, %v457_v54 }
 0x1bc   :  { %517 = vst.msk [vmem:[%s1074_s3 + $0x28] sm:$0xff] %vm511_vm2, %v500_v33 }
 0x1be   :  { %v453_v35 = vpop.permute.xlu2 %452 }
 0x1bf   :  { %v498_v36 = vsel %vm494_vm1, %v401_v34, %v453_v35 }
 0x1c0   :  { %515 = vst.msk [vmem:[%s1074_s3 + $0x18] sm:$0xff] %vm511_vm2, %v498_v36 }
 0x1c2   :  { %v451_v40 = vpop.permute.xlu0 %450 }
 0x1c3   :  { %v497_v39 = vsel %vm494_vm1, %v400_v38, %v451_v40 }
 0x1c4   :  { %514 = vst.msk [vmem:[%s1074_s3 + $0x10] sm:$0xff] %vm511_vm2, %v497_v39 }
 0x1c6   :  { %v477_v30 = vpop.permute.xlu2 %476 }
 0x1c7   :  { %v510_v43 = vsel %vm494_vm1, %v413_v0, %v477_v30 }
 0x1c8   :  { %527 = vst.msk [vmem:[%s1074_s3 + $0x78] sm:$0xff] %vm511_vm2, %v510_v43 }
 0x1c9   :  { %v467_v32 = vpop.permute.xlu1 %466 }
 0x1ca   :  { %v505_v45 = vsel %vm494_vm1, %v408_v44, %v467_v32 }
 0x1cb   :  { %522 = vst.msk [vmem:[%s1074_s3 + $0x50] sm:$0xff] %vm511_vm2, %v505_v45  ;;  %v469_v47 = vpop.permute.xlu0 %468 }
 0x1cc   :  { %v506_v48 = vsel %vm494_vm1, %v409_v46, %v469_v47 }
 0x1cd   :  { %523 = vst.msk [vmem:[%s1074_s3 + $0x58] sm:$0xff] %vm511_vm2, %v506_v48 }
 0x1d3   :  { %v475_v49 = vpop.permute.xlu0 %474 }
 0x1d4   :  { %v509_v50 = vsel %vm494_vm1, %v412_v25, %v475_v49 }
 0x1d5   :  { %526 = vst.msk [vmem:[%s1074_s3 + $0x70] sm:$0xff] %vm511_vm2, %v509_v50 }
 0x1d9   :  { %v461_v56 = vpop.permute.xlu1 %460 }
 0x1da   :  { %v502_v53 = vsel %vm494_vm1, %v405_v41, %v461_v56 }
 0x1db   :  { %519 = vst.msk [vmem:[%s1074_s3 + $0x38] sm:$0xff] %vm511_vm2, %v502_v53 }
 0x1e1   :  { %v473_v59 = vpop.permute.xlu1 %472 }
 0x1e2   :  { %v508_v37 = vsel %vm494_vm1, %v411_v52, %v473_v59 }
 0x1e3   :  { %525 = vst.msk [vmem:[%s1074_s3 + $0x68] sm:$0xff] %vm511_vm2, %v508_v37 }

</bundles_post_ra>
